<compile_context>
chip_gen: v6e
topology: v6e:2x2x1
jax: 0.10.0
libtpu: 0.0.40
codegen_flags: <defaults>
</compile_context>

<pallas_src>
import functools

import jax
import jax.numpy as jnp
from jax.experimental import pallas as pl
from jax.experimental.pallas import tpu as pltpu


# ----------------------------------------------------------------------------
# Deterministic basis matrix (the module's registered buffer `W`).
# ----------------------------------------------------------------------------
def make_imdct_matrix(length: int, window=True, transform: str = "cosine",
                      dtype=jnp.float32) -> jnp.ndarray:
    """Precompute the (L/2, L) inverse-MDCT/MDST basis (transpose of forward basis)."""
    assert 2 <= length and length % 2 == 0
    L2 = length
    L = L2 // 2
    n = jnp.arange(L2, dtype=jnp.float32) + 0.5 + L / 2.0          # phase-shifted time index
    k = (jnp.arange(L, dtype=jnp.float32) + 0.5) * (jnp.pi / L)    # frequency index
    # TODO(synk): diffsptk applies a window-dependent scale; we use the orthonormal
    #             scale sqrt(2/L) for window=True and 2/L otherwise.
    z = (2.0 / L) ** 0.5 if window else 2.0 / L
    phase = jnp.outer(n, k)                                        # (L2, L)
    if transform == "cosine":
        W_fwd = z * jnp.cos(phase)
    elif transform == "sine":
        W_fwd = z * jnp.sin(phase)
    else:
        raise ValueError(f"transform {transform} is not supported.")
    return W_fwd.T.astype(dtype)                                   # (L/2, length)


# ----------------------------------------------------------------------------
# Pallas kernel: (TM, L/2) row-tile of y times a (L/2, TN) column-slab of W.
# ----------------------------------------------------------------------------
def _imdct_kernel(y_ref, w_ref, o_ref):
    o_ref[...] = jnp.dot(
        y_ref[...], w_ref[...], preferred_element_type=jnp.float32
    ).astype(o_ref.dtype)


def _round_up(x: int, m: int) -> int:
    return ((x + m - 1) // m) * m


_VMEM_BUDGET = 32 * 1024 * 1024   # target double-buffered working set (bytes)


def _choose_tiles(M: int, Lh: int, L: int, itemsize: int):
    # Output-column tile: keep the whole row (W fully resident, lane-dense) when
    # the W slab is modest; otherwise tile N with a multiple of 128 so stores stay
    # unmasked and the W tile fits v7x's 64 MiB VMEM.
    if Lh * L * itemsize <= 8 * 1024 * 1024:
        TN = L
    else:
        TN = 512

    # Row tile: as large as possible (<= 512, multiple of 8) under the VMEM budget
    # (factor 2 accounts for Pallas double-buffering of every operand).
    TM = min(512, _round_up(M, 8))
    while TM > 8 and 2 * itemsize * (TM * Lh + Lh * TN + TM * TN) > _VMEM_BUDGET:
        TM = max(8, _round_up(TM // 2, 8))

    # Ensure the 'parallel' grid has >= 2 steps so v7x's two TensorCores both get
    # work when the whole problem would otherwise be a single block.
    if TM >= M and TN >= L and M > 8:
        TM = max(8, _round_up(-(-M // 2), 8))
    return TM, TN


@functools.partial(jax.jit, static_argnames=("length",))
def imdct(y: jnp.ndarray, W: jnp.ndarray, *, length: int) -> jnp.ndarray:
    """Apply inverse MDCT/MDST.  y: (..., L/2) -> out: (..., L)."""
    L = length
    Lh = L // 2
    assert y.shape[-1] * 2 == L, "dimension of input"
    assert W.shape == (Lh, L)

    lead = y.shape[:-1]
    M = 1
    for d in lead:
        M *= d
    y2 = y.reshape(M, Lh)

    # Keep compute dtype consistent with the input (bf16 y -> bf16 W halves the
    # bandwidth-bound DMA traffic); accumulation stays f32 in the kernel.
    Wc = W.astype(y.dtype) if W.dtype != y.dtype else W

    # Tiny problems: output last dim < 128 forces masked lane-sparse stores and
    # the per-step overhead dominates -- XLA handles these better than Pallas.
    if L < 128 or M < 8:
        return jnp.matmul(y2, Wc).reshape(*lead, L)

    itemsize = jnp.dtype(y.dtype).itemsize
    TM, TN = _choose_tiles(M, Lh, L, itemsize)
    grid = (pl.cdiv(M, TM), pl.cdiv(L, TN))

    vmem_need = 2 * itemsize * (TM * Lh + Lh * TN + TM * TN)
    vmem_limit = int(min(48 * 1024 * 1024, max(32 * 1024 * 1024, 2 * vmem_need)))

    cost = pl.CostEstimate(
        flops=2 * M * Lh * L,
        transcendentals=0,
        bytes_accessed=itemsize * (M * Lh + Lh * L + M * L),
    )

    out = pl.pallas_call(
        _imdct_kernel,
        out_shape=jax.ShapeDtypeStruct((M, L), y.dtype),
        grid=grid,
        in_specs=[
            pl.BlockSpec((TM, Lh), lambda i, j: (i, 0)),   # row tile of y, K kept whole
            # NOTE: when TN == L the W block index is constant across the grid;
            # it could be single-buffered (pipeline_mode=pl.Buffered(1)) to halve
            # its VMEM footprint -- left at default buffering for portability.
            pl.BlockSpec((Lh, TN), lambda i, j: (0, j)),   # column slab of the basis
        ],
        out_specs=pl.BlockSpec((TM, TN), lambda i, j: (i, j)),
        compiler_params=pltpu.CompilerParams(
            dimension_semantics=("parallel", "parallel"),
            vmem_limit_bytes=vmem_limit,
        ),
        cost_estimate=cost,
    )(y2, Wc)

    return out.reshape(*lead, L)


# ----------------------------------------------------------------------------
# Reference (pure JAX) for correctness check.
# ----------------------------------------------------------------------------
def imdct_ref(y, W):
    return jnp.matmul(y, W)


if __name__ == "__main__":
    # Main case: exercises the Pallas GEMM path (L >= 128, lane-dense output).
    length = 256                     # L (output length), even
    batch, frames = 4, 64            # arbitrary leading dims -> M = 256 rows
    key = jax.random.PRNGKey(0)
    y = jax.random.normal(key, (batch, frames, length // 2), dtype=jnp.float32)
    W = make_imdct_matrix(length, window=True, transform="cosine", dtype=jnp.float32)

    out = imdct(y, W, length=length)
    jax.block_until_ready(out)
    ref = imdct_ref(y, W)
    assert out.shape == (batch, frames, length)
    assert jnp.allclose(out, ref, atol=1e-3, rtol=1e-3)

    # Tiny case: module-sized L=16, takes the XLA fallback path (a Pallas kernel
    # here would only produce masked, lane-sparse stores).
    length_s = 16
    ys = jax.random.normal(jax.random.PRNGKey(1), (2, 8, length_s // 2), dtype=jnp.float32)
    Ws = make_imdct_matrix(length_s, window=True, transform="cosine", dtype=jnp.float32)
    outs = imdct(ys, Ws, length=length_s)
    jax.block_until_ready(outs)
    assert outs.shape == (2, 8, length_s)
    assert jnp.allclose(outs, imdct_ref(ys, Ws), atol=1e-5, rtol=1e-5)

    print("KERNEL_OK")
</pallas_src>

<mosaic_0001>
module attributes {stable_mosaic.version = 11 : i64} {
  func.func @_imdct_kernel(%arg0: i32, %arg1: i32, %arg2: memref<128x128xf32, #tpu.memory_space<vmem>>, %arg3: memref<128x256xf32, #tpu.memory_space<vmem>>, %arg4: memref<128x256xf32, #tpu.memory_space<vmem>>) attributes {dimension_semantics = [#tpu.dimension_semantics<parallel>, #tpu.dimension_semantics<parallel>], iteration_bounds = array<i64: 2, 1>, scalar_prefetch = 0 : i64, scratch_operands = 0 : i64, tpu.core_type = #tpu.core_type<tc>, window_params = [{transform_indices = @transform_0, window_bounds = array<i64: 128, 128>}, {transform_indices = @transform_1, window_bounds = array<i64: 128, 256>}, {transform_indices = @transform_2, window_bounds = array<i64: 128, 256>}]} {
    %c0 = arith.constant 0 : index
    %c0_0 = arith.constant 0 : index
    %0 = vector.load %arg2[%c0, %c0_0] : memref<128x128xf32, #tpu.memory_space<vmem>>, vector<128x128xf32>
    %c0_1 = arith.constant 0 : index
    %c0_2 = arith.constant 0 : index
    %1 = vector.load %arg3[%c0_1, %c0_2] : memref<128x256xf32, #tpu.memory_space<vmem>>, vector<128x256xf32>
    %cst = arith.constant dense<0.000000e+00> : vector<128x256xf32>
    %2 = tpu.matmul %0, %1, %cst {dimension_numbers = #tpu.dot_dimension_numbers<[1], [0], [0], [1], [0, 0, 1, 1], [], []>} : vector<128x128xf32>, vector<128x256xf32>, vector<128x256xf32> -> vector<128x256xf32>
    %c0_3 = arith.constant 0 : index
    %c0_4 = arith.constant 0 : index
    %3 = vector.load %arg4[%c0_3, %c0_4] : memref<128x256xf32, #tpu.memory_space<vmem>>, vector<128x256xf32>
    tpu.vector_store %arg4[%c0_3, %c0_4], %2 {strides = array<i32>} : memref<128x256xf32, #tpu.memory_space<vmem>>, vector<128x256xf32>,
    return
  }
  func.func @transform_0(%arg0: i32, %arg1: i32) -> (i32, i32) {
    %c0_i32 = arith.constant 0 : i32
    %c0_i32_0 = arith.constant 0 : i32
    return %arg0, %c0_i32 : i32, i32
  }
  func.func @transform_1(%arg0: i32, %arg1: i32) -> (i32, i32) {
    %c0_i32 = arith.constant 0 : i32
    %c0_i32_0 = arith.constant 0 : i32
    return %c0_i32, %arg1 : i32, i32
  }
  func.func @transform_2(%arg0: i32, %arg1: i32) -> (i32, i32) {
    %c0_i32 = arith.constant 0 : i32
    return %arg0, %arg1 : i32, i32
  }
}

</mosaic_0001>

<bundles_post_ra>
// kernel: imdct.1
= control target key start
LH: loop header
LB: loop body
LE: loop exit
PB: predicated region body
PF: predicated region fallthrough
CT: control target
= control target key end

     0   :  { %7 = vsyncpa [#allocation3], 0  ;;  %s1106_s0 = inlined_call_operand.hbm [shape: f32[256,128], index: 0, kind: input, shape index: {}]   ;;  %s1107_s1 = inlined_call_operand.hbm [shape: f32[128,256], index: 1, kind: input, shape index: {}]   ;;  %s1108_s2 = inlined_call_operand.hbm [shape: f32[256,256], index: 2, kind: output, shape index: {}]  }
   0x1   :  { %9 = vsyncpa [#allocation3 + $0x1], 0 }
   0x2   :  { %10 = vsyncpa [#allocation6], 0 }
   0x3   :  { %11 = vsyncpa [#allocation4], 0 }
   0x4   :  { %13 = vsyncpa [#allocation4 + $0x1], 0  ;;  %s855_s9 = smov 0   ;;  %s857_s10 = smov 0  }
   0x5   :  { %s859_s11 = smov 0   ;;  %s861_s12 = smov 0  }
   0x6   :  { %s863_s13 = smov 0   ;;  %s865_s14 = smov 0  }
   0x7 LB: > { %s557_s15 = sadd.s32 4294967295, %s828_s14   ;;  %s558_s16 = sadd.s32 4294967294, %s828_s14   ;;  %s828_s14 = sphi %s865_s14, %s19_s14   ;;  %s824_s13 = sphi %s863_s13, %s1126_s13   ;;  %s820_s12 = sphi %s861_s12, %s1125_s12   ;;  %s816_s11 = sphi %s859_s11, %s1124_s11   ;;  %s812_s10 = sphi %s857_s10, %s1123_s10   ;;  %s808_s9 = sphi %s855_s9, %s1122_s9  }
   0x8   : > { %p51_p0 = scmp.ne.s32.totalorder %s812_s10, %s808_s9  ;;  %p889_p1 = scmp.eq.s32.totalorder %s557_s15, 0 }
   0x9   : > { %p893_p2 = scmp.eq.s32.totalorder %s557_s15, 1  ;;  %p109_p3 = scmp.eq.s32.totalorder %s558_s16, 1 }
   0xa   : > { %p899_p4 = por %p889_p1, %p51_p0  ;;  %p559_p5 = scmp.ge.s32.totalorder %s828_s14, 1 }
   0xb   : > { %p904_p6 = por %p109_p3, %p51_p0  ;;  %p116_p7 = scmp.lt.s32.totalorder %s828_s14, 3 }
   0xc   : > { %s1112_s19 = scalar_select %p899_p4, 1, 0 }
   0xd   : > { %s1113_s20 = scalar_select %p904_p6, 1, 0 }
   0xe   : > { %p909_p8 = pnand %p559_p5, %p116_p7  ;;  %s830_s22 = smov [#allocation5]  }
   0xf   : > { %s131_s23 = sshll.u32 %s830_s22, 4  ;;  %s31_s25 = sadd.s32 1, %s824_s13  ;;  %s132_s23 = int_to_ptr.vmem [resolvable:$true] %s131_s23 }
  0x10   : > { %p618_p9 = pneg %p909_p8  ;;  %s701_s26 = scalar_lea.vmem %s132_s23, 4096 }
  0x11   : > { %p702_p13 = scmp.ne.s32.totalorder %s132_s23, %s701_s26  ;;  %p709_p5 = scmp.lt.s32.totalorder %s132_s23, %s132_s23 }
  0x12   : > { %p918_p11 = pnand %p618_p9, %p889_p1  ;;  %p710_p7 = scmp.lt.s32.totalorder %s701_s26, %s701_s26 }
  0x14   : > { %p692_p12 = pneg %p918_p11  ;;  %p711_p6 = por %p710_p7, %p709_p5 }
  0x16   : > { %p704_p0 = pnand %p702_p13, %p692_p12 }
  0x18   : > { %p705_p3 = pneg %p704_p0 }
  0x1a   : > { %p712_p4 = pnand %p711_p6, %p705_p3 }
  0x1c   : > { %715 = shalt.err (!%p712_p4)
}
  0x1d   : > { %s831_s27 = smov 256   ;;  %s832_s28 = smov 16  }
  0x1e   : > { %621 = dma.hbm_to_vmem [thread:$0]  (!%p918_p11), %s1107_s1, 4096, %s132_s23, [#allocation6], %s831_s27, %s831_s27, %s832_s28  }
  0x1f   : > { %p33_p6 = scmp.ge.s32.totalorder %s31_s25, 2  ;;  %s38_s3 = sadd.s32 1, %s816_s11 }
  0x20   : > { %p45_p4 = scmp.ne.s32.totalorder %s816_s11, %s812_s10  ;;  %p46_p9 = scmp.eq.s32.totalorder %s828_s14, 0 }
  0x21   : > { %s1128_s25 = smov (%p33_p6, %s31_s25), 0  ;;  %p631_p0 = scmp.lt.s32.totalorder %s828_s14, 2 }
  0x22   : > { %p936_p12 = por %p46_p9, %p45_p4  ;;  %p942_p13 = por %p893_p2, %p45_p4 }
  0x23   : > { %s35_s6 = ssub.s32 %s824_s13, %s1128_s25  ;;  %s145_s7 = sand.u32 1, %s816_s11  }
  0x24   : > { %p36_p11 = scmp.eq.s32.totalorder %s35_s6, 0  ;;  %s562_s8 = sshll.u32 %s145_s7, 7 }
  0x25   : > { %s575_s16 = sshll.u32 %s824_s13, 11  ;;  %s149_s26 = scalar_lea.vmem [#allocation2], %s562_s8 }
  0x26   : > { %s951_s15 = scalar_select %p36_p11, %s816_s11, %s38_s3  }
  0x27   : > { %s155_s24 = scalar_lea.hbm %s1106_s0, %s575_s16  ;;  %s156_s27 = sshll.u32 %s149_s26, 4  ;;  %s157_s27 = int_to_ptr.vmem [resolvable:$true] %s156_s27 }
  0x28   : > { %p959_p2 = pnand %p631_p0, %p936_p12  ;;  %s146_s28 = scalar_lea.sflag [#allocation3], %s145_s7 }
  0x29   : > { %s729_s29 = scalar_lea.vmem %s157_s27, 2048  ;;  %s833_s30 = smov [#allocation2]  }
  0x2a   : > { %p718_p3 = pneg %p959_p2  ;;  %p730_p5 = scmp.ne.s32.totalorder %s157_s27, %s729_s29 }
  0x2b   : > { %s734_s3 = sshll.u32 %s833_s30, 4  ;;  %s735_s3 = int_to_ptr.vmem [resolvable:$false] %s734_s3 }
  0x2c   : > { %p732_p7 = pnand %p730_p5, %p718_p3  ;;  %s736_s6 = scalar_lea.vmem %s735_s3, 4096 }
  0x2d   : > { %p737_p4 = scmp.lt.s32.totalorder %s157_s27, %s735_s3  ;;  %p738_p9 = scmp.lt.s32.totalorder %s736_s6, %s729_s29 }
  0x2e   : > { %p733_p6 = pneg %p732_p7 }
  0x2f   : > { %p739_p11 = por %p738_p9, %p737_p4 }
  0x31   : > { %p740_p10 = pnand %p739_p11, %p733_p6 }
  0x33   : > { %743 = shalt.err (!%p740_p10)
}
  0x34   : > { %s834_s4 = smov 128   ;;  %s835_s8 = smov 8  }
  0x35   : > { %625 = dma.hbm_to_vmem [thread:$0]  (!%p959_p2), %s155_s24, 2048, %s157_s27, %s146_s28, %s834_s4, %s834_s4, %s835_s8  }
  0x36   : > { %168 = sbr.rel (%p909_p8) target bundleno = 333 (0x14d), region = 28  ;;  %s970_s7 = sand.u32 (!%p909_p8), 1, %s812_s10  }
  0x37   : > { %s566_s16 = sshll.u32 (!%p909_p8), %s970_s7, 7  ;;  %s171_s22 = scalar_lea.sflag (!%p909_p8), [#allocation3], %s970_s7 }
  0x38   : > { %s974_s23 = scalar_lea.vmem (!%p909_p8), [#allocation2], %s566_s16  ;;  %p1119_p12 = scmp.ne.s32.totalorder (!%p909_p8), %s1112_s19, 0 }
  0x3b   : > { %795 = dma.done.wait (%p1119_p12), %s171_s22, 2048  }
  0x3c   : > { %797 = vsyncadd (%p1119_p12), %s171_s22, 4294965248 }
  0x3d   : > { %799 = dma.done.wait (%p889_p1), [#allocation6], 4096  }
  0x3e   : > { %801 = vsyncadd (%p889_p1), [#allocation6], 4294963200  ;;  %v836_v0 = vmov 0.0   ;;  %v250_v1 = vld [vmem:[#allocation5 + $0xf8] sm:$0xff]  ;;  %v249_v2 = vld [vmem:[#allocation5 + $0xf0] sm:$0xff]  ;;  %s568_s17 = sshll.u32 %s970_s7, 8 }
  0x3f   : > { %315 = vmatprep.mubr.f32.mxu0 %v836_v0  ;;  %363 = vmatprep.mubr.f32.mxu1 %v836_v0  ;;  %v248_v3 = vld [vmem:[#allocation5 + $0xe8] sm:$0xff]  ;;  %v247_v4 = vld [vmem:[#allocation5 + $0xe0] sm:$0xff]  ;;  %v246_v5 = vld [vmem:[#allocation5 + $0xd8] sm:$0xff]  ;;  %s1017_s19 = scalar_lea.vmem [#allocation7], %s568_s17  ;;  %s577_s21 = sshll.u32 %s820_s12, 12 }
  0x40   : > { %251 = vmatprep.subr.mxu0 %v250_v1  ;;  %578 = vmatprep.subr.mxu1 %v250_v1  ;;  %v245_v6 = vld [vmem:[#allocation5 + $0xd0] sm:$0xff]  ;;  %v244_v7 = vld [vmem:[#allocation5 + $0xc8] sm:$0xff]  ;;  %v243_v8 = vld [vmem:[#allocation5 + $0xc0] sm:$0xff]  ;;  %s461_s24 = sshll.u32 %s1017_s19, 4  ;;  %s1052_s18 = scalar_lea.hbm %s1108_s2, %s577_s21  ;;  %s1054_s24 = int_to_ptr.vmem [resolvable:$true] %s461_s24 }
  0x41   : > { %252 = vmatpush1.msra.mxu0 %v249_v2  ;;  %594 = vmatpush1.msra.mxu1 %v249_v2  ;;  %v242_v9 = vld [vmem:[#allocation5 + $0xb8] sm:$0xff]  ;;  %v241_v10 = vld [vmem:[#allocation5 + $0xb0] sm:$0xff]  ;;  %v240_v11 = vld [vmem:[#allocation5 + $0xa8] sm:$0xff]  ;;  %s445_s12 = scalar_lea.sflag [#allocation4], %s970_s7  ;;  %s744_s28 = scalar_lea.vmem %s1054_s24, 4096 }
  0x42   : > { %253 = vmatprep.subr.mxu0 %v248_v3  ;;  %579 = vmatprep.subr.mxu1 %v248_v3  ;;  %v239_v12 = vld [vmem:[#allocation5 + $0xa0] sm:$0xff]  ;;  %v238_v13 = vld [vmem:[#allocation5 + $0x98] sm:$0xff]  ;;  %v237_v14 = vld [vmem:[#allocation5 + $0x90] sm:$0xff]  ;;  %p745_p1 = scmp.ne.s32.totalorder %s1054_s24, %s744_s28  ;;  %s837_s29 = smov [#allocation7]  }
  0x43   : > { %254 = vmatpush1.msra.mxu0 %v247_v4  ;;  %595 = vmatpush1.msra.mxu1 %v247_v4  ;;  %v236_v15 = vld [vmem:[#allocation5 + $0x88] sm:$0xff]  ;;  %v235_v16 = vld [vmem:[#allocation5 + $0x80] sm:$0xff]  ;;  %v234_v17 = vld [vmem:[#allocation5 + $0x78] sm:$0xff]  ;;  %s748_s30 = sshll.u32 %s837_s29, 4  ;;  %s749_s30 = int_to_ptr.vmem [resolvable:$false] %s748_s30 }
  0x44   : > { %255 = vmatprep.subr.mxu0 %v246_v5  ;;  %580 = vmatprep.subr.mxu1 %v246_v5  ;;  %v233_v18 = vld [vmem:[#allocation5 + $0x70] sm:$0xff]  ;;  %v232_v19 = vld [vmem:[#allocation5 + $0x68] sm:$0xff]  ;;  %v231_v20 = vld [vmem:[#allocation5 + $0x60] sm:$0xff]  ;;  %p746_p8 = pnand %p745_p1, %p942_p13  ;;  %s750_s3 = scalar_lea.vmem %s749_s30, 8192 }
  0x45   : > { %256 = vmatpush1.msra.mxu0 %v245_v6  ;;  %596 = vmatpush1.msra.mxu1 %v245_v6  ;;  %v230_v21 = vld [vmem:[#allocation5 + $0x58] sm:$0xff]  ;;  %v229_v22 = vld [vmem:[#allocation5 + $0x50] sm:$0xff]  ;;  %v228_v23 = vld [vmem:[#allocation5 + $0x48] sm:$0xff]  ;;  %p751_p0 = scmp.lt.s32.totalorder %s1054_s24, %s749_s30  ;;  %p752_p2 = scmp.lt.s32.totalorder %s750_s3, %s744_s28 }
  0x46   : > { %257 = vmatprep.subr.mxu0 %v244_v7  ;;  %581 = vmatprep.subr.mxu1 %v244_v7  ;;  %v227_v24 = vld [vmem:[#allocation5 + $0x40] sm:$0xff]  ;;  %v226_v25 = vld [vmem:[#allocation5 + $0x38] sm:$0xff]  ;;  %v225_v26 = vld [vmem:[#allocation5 + $0x30] sm:$0xff]  ;;  %p747_p10 = pneg %p746_p8 }
  0x47   : > { %258 = vmatpush1.msra.mxu0 %v243_v8  ;;  %597 = vmatpush1.msra.mxu1 %v243_v8  ;;  %v224_v27 = vld [vmem:[#allocation5 + $0x28] sm:$0xff]  ;;  %v223_v28 = vld [vmem:[#allocation5 + $0x20] sm:$0xff]  ;;  %v222_v29 = vld [vmem:[#allocation5 + $0x18] sm:$0xff]  ;;  %p753_p3 = por %p752_p2, %p751_p0 }
  0x48   : > { %259 = vmatprep.subr.mxu0 %v242_v9  ;;  %582 = vmatprep.subr.mxu1 %v242_v9  ;;  %v221_v30 = vld [vmem:[#allocation5 + $0x10] sm:$0xff]  ;;  %v220_v31 = vld [vmem:[#allocation5 + $0x8] sm:$0xff]  ;;  %v219_v32 = vld [vmem:[#allocation5] sm:$0xff] }
  0x49   : > { %260 = vmatpush1.msra.mxu0 %v241_v10  ;;  %598 = vmatpush1.msra.mxu1 %v241_v10  ;;  %v203_v33 = vld [vmem:[%s974_s23] sm:$0xff]  ;;  %v204_v35 = vld [vmem:[%s974_s23 + $0x8] sm:$0xff]  ;;  %v205_v37 = vld [vmem:[%s974_s23 + $0x10] sm:$0xff]  ;;  %p754_p5 = pnand %p753_p3, %p747_p10 }
  0x4a   : > { %261 = vmatprep.subr.mxu0 %v240_v11  ;;  %583 = vmatprep.subr.mxu1 %v240_v11  ;;  %v211_v34 = vld [vmem:[%s974_s23 + $0x40] sm:$0xff]  ;;  %v212_v36 = vld [vmem:[%s974_s23 + $0x48] sm:$0xff]  ;;  %v213_v38 = vld [vmem:[%s974_s23 + $0x50] sm:$0xff] }
  0x4b   : > { %262 = vmatpush1.msra.mxu0 %v239_v12  ;;  %599 = vmatpush1.msra.mxu1 %v239_v12  ;;  %v206_v39 = vld [vmem:[%s974_s23 + $0x18] sm:$0xff]  ;;  %v207_v41 = vld [vmem:[%s974_s23 + $0x20] sm:$0xff]  ;;  %v208_v43 = vld [vmem:[%s974_s23 + $0x28] sm:$0xff] }
  0x4c   : > { %263 = vmatprep.subr.mxu0 %v238_v13  ;;  %584 = vmatprep.subr.mxu1 %v238_v13  ;;  %v214_v40 = vld [vmem:[%s974_s23 + $0x58] sm:$0xff]  ;;  %v215_v42 = vld [vmem:[%s974_s23 + $0x60] sm:$0xff]  ;;  %v216_v44 = vld [vmem:[%s974_s23 + $0x68] sm:$0xff] }
  0x4d   : > { %264 = vmatpush1.msra.mxu0 %v237_v14  ;;  %600 = vmatpush1.msra.mxu1 %v237_v14  ;;  %v209_v45 = vld [vmem:[%s974_s23 + $0x30] sm:$0xff]  ;;  %v210_v47 = vld [vmem:[%s974_s23 + $0x38] sm:$0xff] }
  0x4e   : > { %265 = vmatprep.subr.mxu0 %v236_v15  ;;  %585 = vmatprep.subr.mxu1 %v236_v15  ;;  %v217_v46 = vld [vmem:[%s974_s23 + $0x70] sm:$0xff]  ;;  %v218_v48 = vld [vmem:[%s974_s23 + $0x78] sm:$0xff] }
  0x4f   : > { %266 = vmatpush1.msra.mxu0 %v235_v16  ;;  %601 = vmatpush1.msra.mxu1 %v235_v16 }
  0x50   : > { %267 = vmatprep.subr.mxu0 %v234_v17  ;;  %586 = vmatprep.subr.mxu1 %v234_v17 }
  0x51   : > { %268 = vmatpush1.msra.mxu0 %v233_v18  ;;  %602 = vmatpush1.msra.mxu1 %v233_v18 }
  0x52   : > { %269 = vmatprep.subr.mxu0 %v232_v19  ;;  %587 = vmatprep.subr.mxu1 %v232_v19 }
  0x53   : > { %270 = vmatpush1.msra.mxu0 %v231_v20  ;;  %603 = vmatpush1.msra.mxu1 %v231_v20 }
  0x54   : > { %271 = vmatprep.subr.mxu0 %v230_v21  ;;  %588 = vmatprep.subr.mxu1 %v230_v21 }
  0x55   : > { %272 = vmatpush1.msra.mxu0 %v229_v22  ;;  %604 = vmatpush1.msra.mxu1 %v229_v22 }
  0x56   : > { %273 = vmatprep.subr.mxu0 %v228_v23  ;;  %589 = vmatprep.subr.mxu1 %v228_v23 }
  0x57   : > { %274 = vmatpush1.msra.mxu0 %v227_v24  ;;  %605 = vmatpush1.msra.mxu1 %v227_v24 }
  0x58   : > { %275 = vmatprep.subr.mxu0 %v226_v25  ;;  %590 = vmatprep.subr.mxu1 %v226_v25 }
  0x59   : > { %276 = vmatpush1.msra.mxu0 %v225_v26  ;;  %606 = vmatpush1.msra.mxu1 %v225_v26 }
  0x5a   : > { %277 = vmatprep.subr.mxu0 %v224_v27  ;;  %591 = vmatprep.subr.mxu1 %v224_v27 }
  0x5b   : > { %278 = vmatpush1.msra.mxu0 %v223_v28  ;;  %607 = vmatpush1.msra.mxu1 %v223_v28 }
  0x5c   : > { %279 = vmatprep.subr.mxu0 %v222_v29  ;;  %592 = vmatprep.subr.mxu1 %v222_v29 }
  0x5d   : > { %280 = vmatpush1.msra.mxu0 %v221_v30  ;;  %608 = vmatpush1.msra.mxu1 %v221_v30 }
  0x5e   : > { %281 = vmatprep.subr.mxu0 %v220_v31  ;;  %593 = vmatprep.subr.mxu1 %v220_v31 }
  0x5f   : > { %282 = vmatpush1.msra.mxu0 %v219_v32  ;;  %609 = vmatpush1.msra.mxu1 %v219_v32 }
  0x60   : > { %316 = vmatmul.mubr.f32.vlgmr.msra.gmra.mxu0 %v203_v33  ;;  %364 = vmatmul.mubr.f32.vlgmr.msra.gmra.mxu1 %v211_v34 }
  0x61   : > { %321 = vmatprep.mubr.f32.mxu0 %v836_v0  ;;  %369 = vmatprep.mubr.f32.mxu1 %v836_v0 }
  0x64   : > { %322 = vmatmul.mubr.f32.gmra.mxu0 %v204_v35  ;;  %370 = vmatmul.mubr.f32.gmra.mxu1 %v212_v36 }
  0x65   : > { %327 = vmatprep.mubr.f32.mxu0 %v836_v0  ;;  %375 = vmatprep.mubr.f32.mxu1 %v836_v0 }
  0x68   : > { %328 = vmatmul.mubr.f32.gmra.mxu0 %v205_v37  ;;  %376 = vmatmul.mubr.f32.gmra.mxu1 %v213_v38 }
  0x69   : > { %333 = vmatprep.mubr.f32.mxu0 %v836_v0  ;;  %381 = vmatprep.mubr.f32.mxu1 %v836_v0 }
  0x6c   : > { %334 = vmatmul.mubr.f32.gmra.mxu0 %v206_v39  ;;  %382 = vmatmul.mubr.f32.gmra.mxu1 %v214_v40 }
  0x6d   : > { %339 = vmatprep.mubr.f32.mxu0 %v836_v0  ;;  %387 = vmatprep.mubr.f32.mxu1 %v836_v0 }
  0x70   : > { %340 = vmatmul.mubr.f32.gmra.mxu0 %v207_v41  ;;  %388 = vmatmul.mubr.f32.gmra.mxu1 %v215_v42 }
  0x71   : > { %345 = vmatprep.mubr.f32.mxu0 %v836_v0  ;;  %393 = vmatprep.mubr.f32.mxu1 %v836_v0 }
  0x74   : > { %346 = vmatmul.mubr.f32.gmra.mxu0 %v208_v43  ;;  %394 = vmatmul.mubr.f32.gmra.mxu1 %v216_v44 }
  0x75   : > { %351 = vmatprep.mubr.f32.mxu0 %v836_v0  ;;  %399 = vmatprep.mubr.f32.mxu1 %v836_v0 }
  0x78   : > { %352 = vmatmul.mubr.f32.gmra.mxu0 %v209_v45  ;;  %400 = vmatmul.mubr.f32.gmra.mxu1 %v217_v46 }
  0x79   : > { %357 = vmatprep.mubr.f32.mxu0 %v836_v0  ;;  %405 = vmatprep.mubr.f32.mxu1 %v836_v0 }
  0x7c   : > { %358 = vmatmul.mubr.f32.gmra.mxu0 %v210_v47  ;;  %406 = vmatmul.mubr.f32.gmra.mxu1 %v218_v48 }
 0x120   : > { %v317_v49 = vpop.f32.mrf.mxu0  ;;  %v365_v50 = vpop.f32.mrf.mxu1 }
 0x121   : > { %412 = vst [vmem:[%s1017_s19] sm:$0xff] %v317_v49  ;;  %428 = vst [vmem:[%s1017_s19 + $0x80] sm:$0xff] %v365_v50 }
 0x122   : > { %v319_v51 = vpop.f32.mrf.mxu0  ;;  %v367_v52 = vpop.f32.mrf.mxu1 }
 0x123   : > { %413 = vst [vmem:[%s1017_s19 + $0x8] sm:$0xff] %v319_v51  ;;  %429 = vst [vmem:[%s1017_s19 + $0x88] sm:$0xff] %v367_v52 }
 0x124   : > { %v323_v53 = vpop.f32.mrf.mxu0  ;;  %v371_v54 = vpop.f32.mrf.mxu1 }
 0x125   : > { %414 = vst [vmem:[%s1017_s19 + $0x10] sm:$0xff] %v323_v53  ;;  %430 = vst [vmem:[%s1017_s19 + $0x90] sm:$0xff] %v371_v54 }
 0x126   : > { %v325_v55 = vpop.f32.mrf.mxu0  ;;  %v373_v56 = vpop.f32.mrf.mxu1 }
 0x127   : > { %415 = vst [vmem:[%s1017_s19 + $0x18] sm:$0xff] %v325_v55  ;;  %431 = vst [vmem:[%s1017_s19 + $0x98] sm:$0xff] %v373_v56 }
 0x128   : > { %v329_v57 = vpop.f32.mrf.mxu0  ;;  %v377_v58 = vpop.f32.mrf.mxu1 }
 0x129   : > { %416 = vst [vmem:[%s1017_s19 + $0x20] sm:$0xff] %v329_v57  ;;  %432 = vst [vmem:[%s1017_s19 + $0xa0] sm:$0xff] %v377_v58 }
 0x12a   : > { %v331_v59 = vpop.f32.mrf.mxu0  ;;  %v379_v60 = vpop.f32.mrf.mxu1 }
 0x12b   : > { %417 = vst [vmem:[%s1017_s19 + $0x28] sm:$0xff] %v331_v59  ;;  %433 = vst [vmem:[%s1017_s19 + $0xa8] sm:$0xff] %v379_v60 }
 0x12c   : > { %v335_v61 = vpop.f32.mrf.mxu0  ;;  %v383_v62 = vpop.f32.mrf.mxu1 }
 0x12d   : > { %418 = vst [vmem:[%s1017_s19 + $0x30] sm:$0xff] %v335_v61  ;;  %434 = vst [vmem:[%s1017_s19 + $0xb0] sm:$0xff] %v383_v62 }
 0x12e   : > { %v337_v63 = vpop.f32.mrf.mxu0  ;;  %v385_v0 = vpop.f32.mrf.mxu1 }
 0x12f   : > { %419 = vst [vmem:[%s1017_s19 + $0x38] sm:$0xff] %v337_v63  ;;  %435 = vst [vmem:[%s1017_s19 + $0xb8] sm:$0xff] %v385_v0 }
 0x130   : > { %v341_v1 = vpop.f32.mrf.mxu0  ;;  %v389_v2 = vpop.f32.mrf.mxu1 }
 0x131   : > { %420 = vst [vmem:[%s1017_s19 + $0x40] sm:$0xff] %v341_v1  ;;  %436 = vst [vmem:[%s1017_s19 + $0xc0] sm:$0xff] %v389_v2 }
 0x132   : > { %v343_v3 = vpop.f32.mrf.mxu0  ;;  %v391_v4 = vpop.f32.mrf.mxu1 }
 0x133   : > { %421 = vst [vmem:[%s1017_s19 + $0x48] sm:$0xff] %v343_v3  ;;  %437 = vst [vmem:[%s1017_s19 + $0xc8] sm:$0xff] %v391_v4 }
 0x134   : > { %v347_v5 = vpop.f32.mrf.mxu0  ;;  %v395_v6 = vpop.f32.mrf.mxu1 }
 0x135   : > { %422 = vst [vmem:[%s1017_s19 + $0x50] sm:$0xff] %v347_v5  ;;  %438 = vst [vmem:[%s1017_s19 + $0xd0] sm:$0xff] %v395_v6 }
 0x136   : > { %v349_v7 = vpop.f32.mrf.mxu0  ;;  %v397_v8 = vpop.f32.mrf.mxu1 }
 0x137   : > { %423 = vst [vmem:[%s1017_s19 + $0x58] sm:$0xff] %v349_v7  ;;  %439 = vst [vmem:[%s1017_s19 + $0xd8] sm:$0xff] %v397_v8 }
 0x138   : > { %v353_v9 = vpop.f32.mrf.mxu0  ;;  %v401_v10 = vpop.f32.mrf.mxu1 }
 0x139   : > { %424 = vst [vmem:[%s1017_s19 + $0x60] sm:$0xff] %v353_v9  ;;  %440 = vst [vmem:[%s1017_s19 + $0xe0] sm:$0xff] %v401_v10 }
 0x13a   : > { %v355_v11 = vpop.f32.mrf.mxu0  ;;  %v403_v12 = vpop.f32.mrf.mxu1 }
 0x13b   : > { %425 = vst [vmem:[%s1017_s19 + $0x68] sm:$0xff] %v355_v11  ;;  %441 = vst [vmem:[%s1017_s19 + $0xe8] sm:$0xff] %v403_v12 }
 0x13c   : > { %v359_v13 = vpop.f32.mrf.mxu0  ;;  %v407_v14 = vpop.f32.mrf.mxu1 }
 0x13d   : > { %426 = vst [vmem:[%s1017_s19 + $0x70] sm:$0xff] %v359_v13  ;;  %442 = vst [vmem:[%s1017_s19 + $0xf0] sm:$0xff] %v407_v14 }
 0x13e   : > { %v361_v15 = vpop.f32.mrf.mxu0  ;;  %v409_v16 = vpop.f32.mrf.mxu1 }
 0x13f   : > { %427 = vst [vmem:[%s1017_s19 + $0x78] sm:$0xff] %v361_v15  ;;  %443 = vst [vmem:[%s1017_s19 + $0xf8] sm:$0xff] %v409_v16 }
 0x140   : > { %757 = shalt.err (!%p754_p5)
}
 0x141   : > { %s758_s6 = scalar_lea.hbm %s1052_s18, 4096  ;;  %s762_s16 = scalar_lea.hbm %s1108_s2, 8192 }
 0x142   : > { %p759_p7 = scmp.ne.s32.totalorder %s1052_s18, %s758_s6  ;;  %p763_p9 = scmp.lt.s32.totalorder %s1052_s18, %s1108_s2 }
 0x143   : > { %p764_p11 = scmp.lt.s32.totalorder %s762_s16, %s758_s6 }
 0x144   : > { %p760_p6 = pnand %p759_p7, %p942_p13 }
 0x145   : > { %p765_p12 = por %p764_p11, %p763_p9 }
 0x146   : > { %p761_p4 = pneg %p760_p6 }
 0x148   : > { %p766_p1 = pnand %p765_p12, %p761_p4 }
 0x14a   : > { %769 = shalt.err (!%p766_p1)
}
 0x14b   : > { %s838_s17 = smov 256   ;;  %s839_s19 = smov 16  }
 0x14c   : > { %616 = dma.vmem_to_hbm [thread:$0]  (%p942_p13), %s1054_s24, 4096, %s1052_s18, %s445_s12, %s838_s17, %s838_s17, %s839_s19  }
 0x14d PF: > { %s476_s21 = sand.u32 1, %s808_s9   ;;  %p1120_p8 = scmp.ne.s32.totalorder %s1113_s20, 0 }
 0x14e   : > { %p1121_p10 = scmp.ge.s32.totalorder %s828_s14, 2  ;;  %s477_s26 = scalar_lea.sflag [#allocation4], %s476_s21 }
 0x150   : > { %p627_p0 = pnand %p1121_p10, %p1120_p8 }
 0x152   : > { %p628_p2 = pneg %p627_p0 }
 0x154   : > { %803 = dma.done.wait (%p628_p2), %s477_s26, 4096  }
 0x155   : > { %805 = vsyncadd (%p628_p2), %s477_s26, 4294963200  ;;  %s19_s14 = sadd.s32 1, %s828_s14   ;;  %s1122_s9 = smov %s812_s10 }
 0x156   : > { %p16_p3 = scmp.ge.s32.totalorder %s19_s14, 4   ;;  %s1123_s10 = smov %s816_s11 }
 0x157   : > { %s1124_s11 = smov %s951_s15  ;;  %s1125_s12 = smov %s824_s13 }
 0x158   : > { %s1126_s13 = smov %s1128_s25  ;;  %18 = sbr.rel (!%p16_p3) target bundleno = 7 (0x7), region = 78 }
 0x15d   :  { %482 = vsyncpa [#allocation3], 1 }
 0x15e   :  { %484 = vsyncpa [#allocation3 + $0x1], 1 }
 0x15f   :  { %485 = vsyncpa [#allocation6], 1 }
 0x160   :  { %486 = vsyncpa [#allocation4], 1 }
 0x161   :  { %488 = vsyncpa [#allocation4 + $0x1], 1 }

</bundles_post_ra>
